<compile_context>
chip_gen: v5e
topology: v5e:2x2
jax: 0.10.0
libtpu: 0.0.40
codegen_flags: <defaults>
</compile_context>

<pallas_src>
import jax
import jax.numpy as jnp
from jax.experimental import pallas as pl
from jax.experimental.pallas import tpu as pltpu

HIDDEN = 256  # fixed by the module definition


def _deep_sets_kernel(x_ref, w1_ref, b1_ref, w23_ref, b23_ref,
                      w4t_ref, b4_ref, out_ref):
    # encoder stage 1 as a VPU lane-splat outer product (no K=1 matmul):
    #   x: (N, B, 1) f32, w1/b1: (1, 256) f32  ->  h: (N, B, 256) f32
    x = x_ref[...]
    h = jnp.maximum(x * w1_ref[...] + b1_ref[...], 0.0)

    # sum over the set axis BEFORE the linear layers (they distribute over it)
    s = jnp.sum(h, axis=0)                                       # (B, 256) f32

    # fused enc2+dec1: sum_n dec1-pre(enc2(h_n)) == s @ (W2 W3) + N*(b2 W3) + b3
    # bf16 operands on the MXU, f32 accumulation, f32 bias add.
    g = jnp.maximum(
        jnp.dot(s.astype(jnp.bfloat16), w23_ref[...],
                preferred_element_type=jnp.float32) + b23_ref[...],
        0.0)                                                     # (B, 256) f32

    # dec2: 1-wide output -> VPU multiply + lane reduce (skip the MXU)
    out_ref[...] = (jnp.sum(g * w4t_ref[...], axis=-1, keepdims=True)
                    + b4_ref[...])                               # (B, 1) f32


def prepare_params(params, n_set):
    """Fold enc2 into dec1 for a fixed set size N (cache across calls).

    Valid because there is no nonlinearity between enc2 and dec1:
        sum_n enc2(r_n) = s @ W2 + N*b2
        dec1-pre       = (s @ W2 + N*b2) @ W3 + b3 = s @ (W2 W3) + N*(b2 W3) + b3
    """
    w1, b1, w2, b2, w3, b3, w4, b4 = params
    w23 = (w2 @ w3).astype(jnp.bfloat16)            # (256, 256) bf16 MXU weight
    b23 = float(n_set) * (b2 @ w3) + b3             # (1, 256) f32
    w4t = w4.T                                      # (1, 256) f32 lane-reduce weight
    return (w1, b1, w23, b23, w4t, b4)


def deep_sets_forward(x, fused_params):
    """x: (N, B, 1) float32 (stacked x_list).  Returns (B, 1) float32."""
    N, B, _ = x.shape
    w1, b1, w23, b23, w4t, b4 = fused_params
    args = (x, w1, b1, w23, b23, w4t, b4)

    vmem = pl.BlockSpec(memory_space=pltpu.MemorySpace.VMEM)
    return pl.pallas_call(
        _deep_sets_kernel,
        out_shape=jax.ShapeDtypeStruct((B, 1), jnp.float32),
        in_specs=[vmem] * len(args),                 # whole arrays, VMEM-resident
        out_specs=vmem,                              # no grid -> no pipeline bufs
    )(*args)


def init_params(key):
    """Deterministic synthetic weights matching the module's shapes.

    PyTorch shapes: enc1 (256,1), enc2 (256,256), dec1 (256,256), dec2 (1,256)
    (+ biases). Stored transposed here: (in, out)."""
    ks = jax.random.split(key, 8)
    s = 0.05
    w1 = jax.random.normal(ks[0], (1, HIDDEN), jnp.float32) * s
    b1 = jax.random.normal(ks[1], (1, HIDDEN), jnp.float32) * s
    w2 = jax.random.normal(ks[2], (HIDDEN, HIDDEN), jnp.float32) * s
    b2 = jax.random.normal(ks[3], (1, HIDDEN), jnp.float32) * s
    w3 = jax.random.normal(ks[4], (HIDDEN, HIDDEN), jnp.float32) * s
    b3 = jax.random.normal(ks[5], (1, HIDDEN), jnp.float32) * s
    w4 = jax.random.normal(ks[6], (HIDDEN, 1), jnp.float32) * s
    b4 = jax.random.normal(ks[7], (1, 1), jnp.float32) * s
    return (w1, b1, w2, b2, w3, b3, w4, b4)


def deep_sets_reference(x, params):
    """Pure-JAX f32 reference matching the PyTorch forward exactly."""
    w1, b1, w2, b2, w3, b3, w4, b4 = params
    h = jnp.maximum(x @ w1 + b1, 0.0)            # (N, B, 256)
    summed = jnp.sum(h @ w2 + b2, axis=0)        # (B, 256)  (b2 added N times)
    g = jnp.maximum(summed @ w3 + b3, 0.0)       # (B, 256)
    return g @ w4 + b4                            # (B, 1)


if __name__ == "__main__":
    key = jax.random.PRNGKey(0)
    k_x, k_p = jax.random.split(key)

    N, B = 8, 8                                   # set size, batch rows per element
    x = jax.random.normal(k_x, (N, B, 1), jnp.float32)
    params = init_params(k_p)
    fused = prepare_params(params, N)             # W2*W3 fold + bf16 cast (cached)

    out = deep_sets_forward(x, fused)
    out = jax.block_until_ready(out)

    ref = deep_sets_reference(x, params)
    assert out.shape == (B, 1)
    # bf16 matmul weights -> ~3 significant digits; tolerance loosened accordingly.
    assert jnp.allclose(out, ref, atol=2e-2, rtol=2e-2), "mismatch vs reference"

    print("KERNEL_OK")
</pallas_src>

<mosaic_0001>
module attributes {stable_mosaic.version = 11 : i64} {
  func.func @_deep_sets_kernel(%arg0: memref<8x8x1xf32, #tpu.memory_space<vmem>>, %arg1: memref<1x256xf32, #tpu.memory_space<vmem>>, %arg2: memref<1x256xf32, #tpu.memory_space<vmem>>, %arg3: memref<256x256xbf16, #tpu.memory_space<vmem>>, %arg4: memref<1x256xf32, #tpu.memory_space<vmem>>, %arg5: memref<1x256xf32, #tpu.memory_space<vmem>>, %arg6: memref<1x1xf32, #tpu.memory_space<vmem>>, %arg7: memref<8x1xf32, #tpu.memory_space<vmem>>) attributes {dimension_semantics = [], scalar_prefetch = 0 : i64, scratch_operands = 0 : i64, tpu.core_type = #tpu.core_type<tc>} {
    %c0 = arith.constant 0 : index
    %c0_0 = arith.constant 0 : index
    %c0_1 = arith.constant 0 : index
    %0 = vector.load %arg0[%c0, %c0_0, %c0_1] : memref<8x8x1xf32, #tpu.memory_space<vmem>>, vector<8x8x1xf32>
    %c0_2 = arith.constant 0 : index
    %c0_3 = arith.constant 0 : index
    %1 = vector.load %arg1[%c0_2, %c0_3] : memref<1x256xf32, #tpu.memory_space<vmem>>, vector<1x256xf32>
    %2 = vector.shape_cast %1 : vector<1x256xf32> to vector<1x1x256xf32>
    %3 = vector.broadcast %0 : vector<8x8x1xf32> to vector<8x8x256xf32>
    %4 = vector.broadcast %2 : vector<1x1x256xf32> to vector<8x8x256xf32>
    %5 = arith.mulf %3, %4 : vector<8x8x256xf32>
    %c0_4 = arith.constant 0 : index
    %c0_5 = arith.constant 0 : index
    %6 = vector.load %arg2[%c0_4, %c0_5] : memref<1x256xf32, #tpu.memory_space<vmem>>, vector<1x256xf32>
    %7 = vector.shape_cast %6 : vector<1x256xf32> to vector<1x1x256xf32>
    %8 = vector.broadcast %7 : vector<1x1x256xf32> to vector<8x8x256xf32>
    %9 = arith.addf %5, %8 : vector<8x8x256xf32>
    %cst = arith.constant 0.000000e+00 : f32
    %10 = vector.broadcast %cst : f32 to vector<8x8x256xf32>
    %11 = arith.maximumf %9, %10 : vector<8x8x256xf32>
    %cst_6 = arith.constant dense<0.000000e+00> : vector<8x256xf32>
    %12 = vector.multi_reduction <add>, %11, %cst_6 [0] : vector<8x8x256xf32> to vector<8x256xf32>
    %13 = arith.truncf %12 : vector<8x256xf32> to vector<8x256xbf16>
    %c0_7 = arith.constant 0 : index
    %c0_8 = arith.constant 0 : index
    %14 = vector.load %arg3[%c0_7, %c0_8] : memref<256x256xbf16, #tpu.memory_space<vmem>>, vector<256x256xbf16>
    %cst_9 = arith.constant dense<0.000000e+00> : vector<8x256xf32>
    %15 = tpu.matmul %13, %14, %cst_9 {dimension_numbers = #tpu.dot_dimension_numbers<[1], [0], [0], [1], [0, 0, 1, 1], [], []>} : vector<8x256xbf16>, vector<256x256xbf16>, vector<8x256xf32> -> vector<8x256xf32>
    %c0_10 = arith.constant 0 : index
    %c0_11 = arith.constant 0 : index
    %16 = vector.load %arg4[%c0_10, %c0_11] : memref<1x256xf32, #tpu.memory_space<vmem>>, vector<1x256xf32>
    %17 = vector.broadcast %16 : vector<1x256xf32> to vector<8x256xf32>
    %18 = arith.addf %15, %17 : vector<8x256xf32>
    %cst_12 = arith.constant 0.000000e+00 : f32
    %19 = vector.broadcast %cst_12 : f32 to vector<8x256xf32>
    %20 = arith.maximumf %18, %19 : vector<8x256xf32>
    %c0_13 = arith.constant 0 : index
    %c0_14 = arith.constant 0 : index
    %21 = vector.load %arg5[%c0_13, %c0_14] : memref<1x256xf32, #tpu.memory_space<vmem>>, vector<1x256xf32>
    %22 = vector.broadcast %21 : vector<1x256xf32> to vector<8x256xf32>
    %23 = arith.mulf %20, %22 : vector<8x256xf32>
    %cst_15 = arith.constant dense<0.000000e+00> : vector<8xf32>
    %24 = vector.multi_reduction <add>, %23, %cst_15 [1] : vector<8x256xf32> to vector<8xf32>
    %25 = vector.shape_cast %24 : vector<8xf32> to vector<8x1xf32>
    %c0_16 = arith.constant 0 : index
    %c0_17 = arith.constant 0 : index
    %26 = vector.load %arg6[%c0_16, %c0_17] : memref<1x1xf32, #tpu.memory_space<vmem>>, vector<1x1xf32>
    %27 = vector.broadcast %26 : vector<1x1xf32> to vector<8x1xf32>
    %28 = arith.addf %25, %27 : vector<8x1xf32>
    %c0_18 = arith.constant 0 : index
    %c0_19 = arith.constant 0 : index
    %29 = vector.load %arg7[%c0_18, %c0_19] : memref<8x1xf32, #tpu.memory_space<vmem>>, vector<8x1xf32>
    tpu.vector_store %arg7[%c0_18, %c0_19], %28 {strides = array<i32>} : memref<8x1xf32, #tpu.memory_space<vmem>>, vector<8x1xf32>,
    return
  }
}

</mosaic_0001>

<bundles_post_ra>
// kernel: tpu_custom_call.1
= control target key start
LH: loop header
LB: loop body
LE: loop exit
PB: predicated region body
PF: predicated region fallthrough
CT: control target
= control target key end

     0   :  { %s726_s0 = inlined_call_operand.vmem [shape: f32[8,8,1], index: 0, kind: input, shape index: {}]   ;;  %s727_s1 = inlined_call_operand.vmem [shape: f32[1,256], index: 1, kind: input, shape index: {}]   ;;  %s728_s2 = inlined_call_operand.vmem [shape: f32[1,256], index: 2, kind: input, shape index: {}]   ;;  %s729_s3 = inlined_call_operand.hbm [shape: bf16[256,256], index: 3, kind: input, shape index: {}]   ;;  %s730_s4 = inlined_call_operand.vmem [shape: f32[1,256], index: 4, kind: input, shape index: {}]   ;;  %s731_s5 = inlined_call_operand.vmem [shape: f32[1,256], index: 5, kind: input, shape index: {}]   ;;  %s732_s6 = inlined_call_operand.<no memory space> [shape: f32[1,1], index: 6, kind: input, shape index: {}]   ;;  %s733_s7 = inlined_call_operand.vmem [shape: f32[8,1], index: 7, kind: output, shape index: {}]  }
   0x1   :  { %v12_v0 = vstv %s732_s6 }
   0x2   :  { %13 = vst [vmem:[#allocation2] sm:$0x1] %v12_v0 }
   0x3   :  { %14 = vsyncpa [#allocation4], 0  ;;  %s25_s28 = sshll.u32 %s729_s3, 4  ;;  %s637_s29 = smov [#allocation3]   ;;  %s26_s28 = int_to_ptr.hbm [resolvable:$true] %s25_s28 }
   0x4   :  { %s27_s30 = sshll.u32 %s637_s29, 4  ;;  %s638_s8 = smov 128   ;;  %s28_s30 = int_to_ptr.vmem [resolvable:$true] %s27_s30 }
   0x5   :  { %s639_s9 = smov 8  }
   0x6   :  { %33 = dma.hbm_to_vmem [thread:$0]  %s26_s28, 4096, %s28_s30, [#allocation4], %s638_s8, %s638_s8, %s639_s9  }
   0x7   :  { %635 = dma.done.wait [#allocation4], 4096  }
   0x8   :  { %636 = vsyncadd [#allocation4], 4294963200  ;;  %v640_v1 = vmov 0   ;;  %v46_v2 = vld [vmem:[%s726_s0 + $0x10] sm:$0xff]  ;;  %v44_v3 = vld [vmem:[%s726_s0] sm:$0xff]  ;;  %vm436_vm0 = vcmask 7168  }
   0x9   :  { %608 = vset.pattern.permute.xlu1 %v640_v1  ;;  %607 = vset.pattern.permute.xlu0 %v640_v1  ;;  %v48_v4 = vld [vmem:[%s726_s0 + $0x20] sm:$0xff]  ;;  %v501_v5 = vld [vmem:[#allocation3 + $0x70] sm:$0xf]  ;;  %v586_v6 = vld [vmem:[#allocation3 + $0x74] sm:$0xf0] }
   0xa   :  { %609 = vset.pattern.permute.xlu2 %v640_v1  ;;  %65 = vperm.xlu1 %608, %v46_v2   ;;  %v565_v7 = vld [vmem:[#allocation3 + $0xf0] sm:$0xf]  ;;  %v602_v8 = vld [vmem:[#allocation3 + $0xf4] sm:$0xf0]  ;;  %v502_v9 = vor.u32 %v586_v6, %v501_v5  ;;  %v585_v11 = vld [vmem:[#allocation3 + $0x74] sm:$0xf] }
   0xb   :  { %55 = vperm.xlu0 %607, %v44_v3   ;;  %75 = vperm.xlu2 %609, %v48_v4   ;;  %v566_v10 = vor.u32 %v602_v8, %v565_v7  ;;  %v503_v12 = vld [vmem:[#allocation3 + $0x78] sm:$0xf0]  ;;  %v601_v13 = vld [vmem:[#allocation3 + $0xf4] sm:$0xf]  ;;  %v45_v17 = vld [vmem:[%s726_s0 + $0x8] sm:$0xff] }
   0xc   :  { %v506_v14 = vor.u32 %v585_v11, %v503_v12  ;;  %v567_v15 = vld [vmem:[#allocation3 + $0xf8] sm:$0xf0]  ;;  %366 = vmatpush.bf16.msra.mxu0 %v502_v9  ;;  %v49_v19 = vld [vmem:[%s726_s0 + $0x28] sm:$0xff]  ;;  %v50_v21 = vld [vmem:[%s726_s0 + $0x30] sm:$0xff] }
   0xd   :  { %v47_v16 = vld [vmem:[%s726_s0 + $0x18] sm:$0xff]  ;;  %379 = vmatpush.bf16.msra.mxu1 %v566_v10  ;;  %v570_v18 = vor.u32 %v601_v13, %v567_v15  ;;  %v493_v22 = vld [vmem:[#allocation3 + $0x60] sm:$0xf]  ;;  %v584_v23 = vld [vmem:[#allocation3 + $0x64] sm:$0xf0] }
   0xe   :  { %392 = vmatpush.bf16.msra.mxu2 %v506_v14  ;;  %v51_v20 = vld [vmem:[%s726_s0 + $0x38] sm:$0xff]  ;;  %v557_v24 = vld [vmem:[#allocation3 + $0xe0] sm:$0xf]  ;;  %v494_v25 = vor.u32 %v584_v23, %v493_v22  ;;  %v600_v26 = vld [vmem:[#allocation3 + $0xe4] sm:$0xf0] }
   0xf   :  { %405 = vmatpush.bf16.msra.mxu3 %v570_v18  ;;  %v583_v27 = vld [vmem:[#allocation3 + $0x64] sm:$0xf]  ;;  %v495_v28 = vld [vmem:[#allocation3 + $0x68] sm:$0xf0]  ;;  %v558_v29 = vor.u32 %v600_v26, %v557_v24  ;;  %v485_v34 = vld [vmem:[#allocation3 + $0x50] sm:$0xf] }
  0x10   :  { %v498_v30 = vor.u32 %v583_v27, %v495_v28  ;;  %v599_v31 = vld [vmem:[#allocation3 + $0xe4] sm:$0xf]  ;;  %v559_v32 = vld [vmem:[#allocation3 + $0xe8] sm:$0xf0]  ;;  %367 = vmatpush.bf16.msra.mxu0 %v494_v25  ;;  %v582_v35 = vld [vmem:[#allocation3 + $0x54] sm:$0xf0] }
  0x11   :  { %v562_v33 = vor.u32 %v599_v31, %v559_v32  ;;  %380 = vmatpush.bf16.msra.mxu1 %v558_v29  ;;  %v549_v36 = vld [vmem:[#allocation3 + $0xd0] sm:$0xf]  ;;  %v486_v37 = vor.u32 %v582_v35, %v485_v34  ;;  %v598_v38 = vld [vmem:[#allocation3 + $0xd4] sm:$0xf0]  ;;  %v581_v39 = vld [vmem:[#allocation3 + $0x54] sm:$0xf] }
  0x12   :  { %70 = vperm.xlu1 %608, %v47_v16   ;;  %393 = vmatpush.bf16.msra.mxu2 %v498_v30  ;;  %v487_v40 = vld [vmem:[#allocation3 + $0x58] sm:$0xf0]  ;;  %v550_v41 = vor.u32 %v598_v38, %v549_v36  ;;  %v597_v43 = vld [vmem:[#allocation3 + $0xd4] sm:$0xf]  ;;  %v477_v46 = vld [vmem:[#allocation3 + $0x40] sm:$0xf] }
  0x13   :  { %60 = vperm.xlu0 %607, %v45_v17   ;;  %80 = vperm.xlu2 %609, %v49_v19   ;;  %v490_v42 = vor.u32 %v581_v39, %v487_v40  ;;  %v551_v44 = vld [vmem:[#allocation3 + $0xd8] sm:$0xf0]  ;;  %v580_v47 = vld [vmem:[#allocation3 + $0x44] sm:$0xf0]  ;;  %v541_v48 = vld [vmem:[#allocation3 + $0xc0] sm:$0xf] }
  0x14   :  { %406 = vmatpush.bf16.msra.mxu3 %v562_v33  ;;  %368 = vmatpush.bf16.msra.mxu0 %v486_v37  ;;  %v554_v45 = vor.u32 %v597_v43, %v551_v44  ;;  %v478_v49 = vor.u32 %v580_v47, %v477_v46  ;;  %v596_v50 = vld [vmem:[#allocation3 + $0xc4] sm:$0xf0]  ;;  %v579_v51 = vld [vmem:[#allocation3 + $0x44] sm:$0xf]  ;;  %v479_v52 = vld [vmem:[#allocation3 + $0x48] sm:$0xf0] }
  0x15   :  { %381 = vmatpush.bf16.msra.mxu1 %v550_v41  ;;  %v542_v53 = vor.u32 %v596_v50, %v541_v48  ;;  %v482_v54 = vor.u32 %v579_v51, %v479_v52  ;;  %v595_v55 = vld [vmem:[#allocation3 + $0xc4] sm:$0xf]  ;;  %v543_v56 = vld [vmem:[#allocation3 + $0xc8] sm:$0xf0]  ;;  %v469_v58 = vld [vmem:[#allocation3 + $0x30] sm:$0xf] }
  0x16   :  { %394 = vmatpush.bf16.msra.mxu2 %v490_v42  ;;  %v546_v57 = vor.u32 %v595_v55, %v543_v56  ;;  %v578_v59 = vld [vmem:[#allocation3 + $0x34] sm:$0xf0]  ;;  %v533_v60 = vld [vmem:[#allocation3 + $0xb0] sm:$0xf]  ;;  %v577_v63 = vld [vmem:[#allocation3 + $0x34] sm:$0xf] }
  0x17   :  { %v470_v61 = vor.u32 %v578_v59, %v469_v58  ;;  %v594_v62 = vld [vmem:[#allocation3 + $0xb4] sm:$0xf0]  ;;  %v471_v0 = vld [vmem:[#allocation3 + $0x38] sm:$0xf0]  ;;  %v593_v3 = vld [vmem:[#allocation3 + $0xb4] sm:$0xf] }
  0x18   :  { %407 = vmatpush.bf16.msra.mxu3 %v554_v45  ;;  %369 = vmatpush.bf16.msra.mxu0 %v478_v49  ;;  %v534_v1 = vor.u32 %v594_v62, %v533_v60  ;;  %v474_v2 = vor.u32 %v577_v63, %v471_v0  ;;  %v535_v4 = vld [vmem:[#allocation3 + $0xb8] sm:$0xf0]  ;;  %v461_v6 = vld [vmem:[#allocation3 + $0x20] sm:$0xf]  ;;  %v576_v7 = vld [vmem:[#allocation3 + $0x24] sm:$0xf0] }
  0x19   :  { %382 = vmatpush.bf16.msra.mxu1 %v542_v53  ;;  %v538_v5 = vor.u32 %v593_v3, %v535_v4  ;;  %v525_v8 = vld [vmem:[#allocation3 + $0xa0] sm:$0xf]  ;;  %v462_v9 = vor.u32 %v576_v7, %v461_v6  ;;  %v592_v10 = vld [vmem:[#allocation3 + $0xa4] sm:$0xf0]  ;;  %v575_v11 = vld [vmem:[#allocation3 + $0x24] sm:$0xf] }
  0x1a   :  { %90 = vperm.xlu1 %608, %v51_v20   ;;  %395 = vmatpush.bf16.msra.mxu2 %v482_v54  ;;  %v463_v12 = vld [vmem:[#allocation3 + $0x28] sm:$0xf0]  ;;  %v526_v13 = vor.u32 %v592_v10, %v525_v8  ;;  %v591_v15 = vld [vmem:[#allocation3 + $0xa4] sm:$0xf]  ;;  %v453_v18 = vld [vmem:[#allocation3 + $0x10] sm:$0xf] }
  0x1b   :  { %85 = vperm.xlu0 %607, %v50_v21   ;;  %v466_v14 = vor.u32 %v575_v11, %v463_v12  ;;  %v527_v16 = vld [vmem:[#allocation3 + $0xa8] sm:$0xf0]  ;;  %v574_v19 = vld [vmem:[#allocation3 + $0x14] sm:$0xf0]  ;;  %v517_v20 = vld [vmem:[#allocation3 + $0x90] sm:$0xf] }
  0x1c   :  { %408 = vmatpush.bf16.msra.mxu3 %v546_v57  ;;  %370 = vmatpush.bf16.msra.mxu0 %v470_v61  ;;  %v530_v17 = vor.u32 %v591_v15, %v527_v16  ;;  %v454_v21 = vor.u32 %v574_v19, %v453_v18  ;;  %v590_v22 = vld [vmem:[#allocation3 + $0x94] sm:$0xf0]  ;;  %v573_v23 = vld [vmem:[#allocation3 + $0x14] sm:$0xf]  ;;  %v455_v25 = vld [vmem:[#allocation3 + $0x18] sm:$0xf0] }
  0x1d   :  { %383 = vmatpush.bf16.msra.mxu1 %v534_v1  ;;  %v518_v24 = vor.u32 %v590_v22, %v517_v20  ;;  %v589_v26 = vld [vmem:[#allocation3 + $0x94] sm:$0xf]  ;;  %v519_v27 = vld [vmem:[#allocation3 + $0x98] sm:$0xf0]  ;;  %v458_v28 = vor.u32 %v573_v23, %v455_v25  ;;  %v445_v30 = vld [vmem:[#allocation3] sm:$0xf] }
  0x1e   :  { %396 = vmatpush.bf16.msra.mxu2 %v474_v2  ;;  %v522_v29 = vor.u32 %v589_v26, %v519_v27  ;;  %v572_v31 = vld [vmem:[#allocation3 + $0x4] sm:$0xf0]  ;;  %v509_v32 = vld [vmem:[#allocation3 + $0x80] sm:$0xf]  ;;  %v571_v35 = vld [vmem:[#allocation3 + $0x4] sm:$0xf] }
  0x1f   :  { %v446_v33 = vor.u32 %v572_v31, %v445_v30  ;;  %v588_v34 = vld [vmem:[#allocation3 + $0x84] sm:$0xf0]  ;;  %v447_v36 = vld [vmem:[#allocation3 + $0x8] sm:$0xf0]  ;;  %v587_v39 = vld [vmem:[#allocation3 + $0x84] sm:$0xf] }
  0x20   :  { %409 = vmatpush.bf16.msra.mxu3 %v538_v5  ;;  %371 = vmatpush.bf16.msra.mxu0 %v462_v9  ;;  %v510_v37 = vor.u32 %v588_v34, %v509_v32  ;;  %v450_v38 = vor.u32 %v571_v35, %v447_v36  ;;  %v511_v40 = vld [vmem:[#allocation3 + $0x88] sm:$0xf0]  ;;  %v52_v42 = vld [vmem:[%s727_s1] sm:$0x3] }
  0x21   :  { %384 = vmatpush.bf16.msra.mxu1 %v526_v13  ;;  %v514_v41 = vor.u32 %v587_v39, %v511_v40  ;;  %v94_v44 = vperm.slane %v52_v42, 0  ;;  %v95_v45 = vperm.slane %v52_v42, 1  ;;  %v114_v48 = vld [vmem:[%s728_s2] sm:$0x3] }
  0x22   :  { %397 = vmatpush.bf16.msra.mxu2 %v466_v14  ;;  %v116_v49 = vperm.slane %v114_v48, 0  ;;  %v117_v50 = vperm.slane %v114_v48, 1 }
  0x24   :  { %410 = vmatpush.bf16.msra.mxu3 %v530_v17  ;;  %372 = vmatpush.bf16.msra.mxu0 %v454_v21 }
  0x25   :  { %385 = vmatpush.bf16.msra.mxu1 %v518_v24 }
  0x26   :  { %398 = vmatpush.bf16.msra.mxu2 %v458_v28 }
  0x28   :  { %411 = vmatpush.bf16.msra.mxu3 %v522_v29  ;;  %373 = vmatpush.bf16.msra.mxu0 %v446_v33 }
  0x29   :  { %386 = vmatpush.bf16.msra.mxu1 %v510_v37 }
  0x2a   :  { %399 = vmatpush.bf16.msra.mxu2 %v450_v38 }
  0x2c   :  { %412 = vmatpush.bf16.msra.mxu3 %v514_v41 }
  0x65   :  { %v76_v43 = vpop.permute.xlu2 %75 }
  0x66   :  { %v106_v0 = vmul.f32 %v94_v44, %v76_v43  ;;  %v107_v1 = vmul.f32 %v95_v45, %v76_v43 }
  0x68   :  { %v128_v14 = vadd.f32 %v116_v49, %v106_v0  ;;  %v129_v15 = vadd.f32 %v117_v50, %v107_v1 }
  0x6a   :  { %v144_v32 = vmax.f32 %v128_v14, 0.0  ;;  %v145_v33 = vmax.f32 %v129_v15, 0.0  ;;  %v610_v15 = vld [vmem:[#allocation2] ss:$0 sm:$0xff] }
  0x6d   :  { %v81_v59 = vpop.permute.xlu2 %80 }
  0x6e   :  { %v108_v6 = vmul.f32 %v94_v44, %v81_v59  ;;  %v109_v7 = vmul.f32 %v95_v45, %v81_v59 }
  0x70   :  { %v130_v20 = vadd.f32 %v116_v49, %v108_v6  ;;  %v131_v21 = vadd.f32 %v117_v50, %v109_v7 }
  0x72   :  { %v146_v36 = vmax.f32 %v130_v20, 0.0  ;;  %v147_v37 = vmax.f32 %v131_v21, 0.0 }
  0x7c   :  { %v66_v46 = vpop.permute.xlu1 %65 }
  0x7d   :  { %v56_v47 = vpop.permute.xlu0 %55  ;;  %v102_v53 = vmul.f32 %v94_v44, %v66_v46  ;;  %v103_v54 = vmul.f32 %v95_v45, %v66_v46 }
  0x7e   :  { %v98_v51 = vmul.f32 %v94_v44, %v56_v47  ;;  %v99_v52 = vmul.f32 %v95_v45, %v56_v47 }
  0x7f   :  { %v124_v2 = vadd.f32 %v116_v49, %v102_v53  ;;  %v125_v3 = vadd.f32 %v117_v50, %v103_v54 }
  0x80   :  { %v120_v55 = vadd.f32 %v116_v49, %v98_v51  ;;  %v121_v56 = vadd.f32 %v117_v50, %v99_v52 }
  0x81   :  { %v140_v16 = vmax.f32 %v124_v2, 0.0  ;;  %v141_v17 = vmax.f32 %v125_v3, 0.0 }
  0x82   :  { %v136_v10 = vmax.f32 %v120_v55, 0.0  ;;  %v137_v11 = vmax.f32 %v121_v56, 0.0 }
  0x84   :  { %v71_v57 = vpop.permute.xlu1 %70 }
  0x85   :  { %v61_v58 = vpop.permute.xlu0 %60  ;;  %v104_v60 = vmul.f32 %v94_v44, %v71_v57  ;;  %v105_v61 = vmul.f32 %v95_v45, %v71_v57 }
  0x86   :  { %v100_v62 = vmul.f32 %v94_v44, %v61_v58  ;;  %v101_v63 = vmul.f32 %v95_v45, %v61_v58 }
  0x87   :  { %v126_v8 = vadd.f32 %v116_v49, %v104_v60  ;;  %v127_v9 = vadd.f32 %v117_v50, %v105_v61 }
  0x88   :  { %v122_v4 = vadd.f32 %v116_v49, %v100_v62  ;;  %v123_v5 = vadd.f32 %v117_v50, %v101_v63  ;;  %v420_v63 = vld [vmem:[%s731_s5] sm:$0x3] }
  0x89   :  { %v142_v22 = vmax.f32 %v126_v8, 0.0  ;;  %v143_v23 = vmax.f32 %v127_v9, 0.0  ;;  %v422_v6 = vperm.slane %v420_v63, 0  ;;  %v423_v8 = vperm.slane %v420_v63, 1 }
  0x8a   :  { %v138_v12 = vmax.f32 %v122_v4, 0.0  ;;  %v139_v13 = vmax.f32 %v123_v5, 0.0 }
  0x8c   :  { %v152_v18 = vadd.f32 %v138_v12, %v136_v10  ;;  %v159_v19 = vadd.f32 %v139_v13, %v137_v11  ;;  %v91_v24 = vpop.permute.xlu1 %90 }
  0x8d   :  { %v86_v25 = vpop.permute.xlu0 %85  ;;  %v112_v28 = vmul.f32 %v94_v44, %v91_v24  ;;  %v113_v29 = vmul.f32 %v95_v45, %v91_v24 }
  0x8e   :  { %v153_v26 = vadd.f32 %v152_v18, %v140_v16  ;;  %v160_v27 = vadd.f32 %v159_v19, %v141_v17  ;;  %v110_v30 = vmul.f32 %v94_v44, %v86_v25  ;;  %v111_v31 = vmul.f32 %v95_v45, %v86_v25 }
  0x8f   :  { %v134_v40 = vadd.f32 %v116_v49, %v112_v28  ;;  %v135_v41 = vadd.f32 %v117_v50, %v113_v29 }
  0x90   :  { %v154_v34 = vadd.f32 %v153_v26, %v142_v22  ;;  %v161_v35 = vadd.f32 %v160_v27, %v143_v23  ;;  %v132_v38 = vadd.f32 %v116_v49, %v110_v30  ;;  %v133_v39 = vadd.f32 %v117_v50, %v111_v31  ;;  %v200_v49 = vld [vmem:[%s730_s4] sm:$0x3] }
  0x91   :  { %v150_v52 = vmax.f32 %v134_v40, 0.0  ;;  %v151_v53 = vmax.f32 %v135_v41, 0.0  ;;  %v202_v50 = vperm.slane %v200_v49, 0  ;;  %v203_v61 = vperm.slane %v200_v49, 1 }
  0x92   :  { %v155_v42 = vadd.f32 %v154_v34, %v144_v32  ;;  %v162_v43 = vadd.f32 %v161_v35, %v145_v33  ;;  %v148_v46 = vmax.f32 %v132_v38, 0.0  ;;  %v149_v47 = vmax.f32 %v133_v39, 0.0 }
  0x94   :  { %v156_v48 = vadd.f32 %v155_v42, %v146_v36  ;;  %v163_v51 = vadd.f32 %v162_v43, %v147_v37 }
  0x96   :  { %v157_v44 = vadd.f32 %v156_v48, %v148_v46  ;;  %v164_v45 = vadd.f32 %v163_v51, %v149_v47 }
  0x98   :  { %v158_v54 = vadd.f32 %v157_v44, %v150_v52  ;;  %v165_v55 = vadd.f32 %v164_v45, %v151_v53 }
  0x9a   :  { %v166_v56 = vpack.c.bf16 %v158_v54, %v158_v54  ;;  %v167_v57 = vpack.c.bf16 %v165_v55, %v165_v55 }
  0x9c   :  { %374 = vmatmul.bf16.vlgmr.msra.gmra.mxu0 %v166_v56  ;;  %387 = vmatmul.bf16.vlgmr.msra.gmra.mxu1 %v167_v57 }
  0x9d   :  { %400 = vmatmul.bf16.vlgmr.msra.gmra.mxu2 %v166_v56  ;;  %413 = vmatmul.bf16.vlgmr.msra.gmra.mxu3 %v167_v57 }
 0x119   :  { %v375_v58 = vpop.f32.mrf.mxu0  ;;  %v388_v59 = vpop.f32.mrf.mxu1 }
 0x11a   :  { %v376_v60 = vadd.f32 %v375_v58, %v202_v50 }
 0x11c   :  { %v389_v62 = vadd.f32 %v388_v59, %v376_v60 }
 0x11e   :  { %v418_v5 = vmax.f32 %v389_v62, 0.0 }
 0x120   :  { %v401_v0 = vpop.f32.mrf.mxu2  ;;  %v414_v1 = vpop.f32.mrf.mxu3  ;;  %v426_v10 = vmul.f32 %v422_v6, %v418_v5 }
 0x121   :  { %v402_v2 = vadd.f32 %v401_v0, %v203_v61  ;;  %v377_v3 = vpop.f32.mrf.mxu0  ;;  %v390_v4 = vpop.f32.mrf.mxu1 }
 0x123   :  { %v415_v7 = vadd.f32 %v414_v1, %v402_v2 }
 0x125   :  { %v419_v9 = vmax.f32 %v415_v7, 0.0 }
 0x127   :  { %v427_v11 = vmul.f32 %v423_v8, %v419_v9 }
 0x128   :  { %v403_v12 = vpop.f32.mrf.mxu2  ;;  %v416_v13 = vpop.f32.mrf.mxu3 }
 0x129   :  { %v428_v14 = vadd.f32 %v427_v11, %v426_v10 }
 0x12b   :  { %429 = vadd.xlane.f32.xlu2 %v428_v14 }
 0x19e   :  { %v430_v16 = vpop.xlane.xlu2 %429 }
 0x19f   :  { %v435_v17 = vadd.f32 %v610_v15, %v430_v16 }
 0x1a1   :  { %437 = vst.msk [vmem:[%s733_s7] sm:$0xff] %vm436_vm0, %v435_v17 }
 0x1a2   :  { %442 = vsyncpa [#allocation4], 1 }

</bundles_post_ra>
